<compile_context>
chip_gen: v7x
topology: tpu7x:2x2x1
jax: 0.10.0
libtpu: 0.0.40
codegen_flags: <defaults>
</compile_context>

<pallas_src>
import math

import jax
import jax.numpy as jnp
from jax import lax
from jax.experimental import pallas as pl
from jax.experimental.pallas import tpu as pltpu

_INV_SQRT2 = 1.0 / math.sqrt(2.0)


def _round_up(x, m):
    return ((x + m - 1) // m) * m


def _cdiv(a, b):
    return (a + b - 1) // b


def _gelu(h, approximate):
    # h is fp32 (matmul accumulator dtype).
    if approximate:
        # tanh approximation -> EUP slot (nearly free next to the MXU).
        return jax.nn.gelu(h, approximate=True)
    # Exact erf-based GELU (matches trajbert / BERT gelu). gelu(0)=0, so
    # zero-padded hidden columns contribute nothing downstream.
    return 0.5 * h * (1.0 + lax.erf(h * jnp.float32(_INV_SQRT2)))


def _make_resident_kernel(use_bf16, approximate):
    """Single-step FFN: W1/W2 fully resident in VMEM, no reduction axis."""

    def kernel(x_ref, w1_ref, b1_ref, w2_ref, b2_ref, o_ref):
        x = x_ref[...]
        w1 = w1_ref[...]
        if use_bf16:
            x = x.astype(jnp.bfloat16)
            w1 = w1.astype(jnp.bfloat16)
        h = jnp.dot(x, w1, preferred_element_type=jnp.float32)
        h = h + b1_ref[...].astype(jnp.float32)
        h = _gelu(h, approximate)

        w2 = w2_ref[...]
        if use_bf16:
            h = h.astype(jnp.bfloat16)
            w2 = w2.astype(jnp.bfloat16)
        else:
            h = h.astype(w2.dtype)
        out = jnp.dot(h, w2, preferred_element_type=jnp.float32)
        out = out + b2_ref[...].astype(jnp.float32)
        o_ref[...] = out.astype(o_ref.dtype)

    return kernel


def _make_ktiled_kernel(acc_in_out, use_bf16, approximate):
    """d_ff-tiled FFN (fallback for weights too large to keep resident)."""

    def kernel(x_ref, w1_ref, b1_ref, w2_ref, b2_ref, o_ref, *scratch):
        # fp32 output -> accumulate directly into o_ref (resident across k).
        acc_ref = o_ref if acc_in_out else scratch[0]
        k = pl.program_id(1)

        @pl.when(k == 0)
        def _init():
            acc_ref[...] = jnp.zeros_like(acc_ref)

        x = x_ref[...]
        w1 = w1_ref[...]
        if use_bf16:
            x = x.astype(jnp.bfloat16)
            w1 = w1.astype(jnp.bfloat16)
        h = jnp.dot(x, w1, preferred_element_type=jnp.float32)
        h = h + b1_ref[...].astype(jnp.float32)
        h = _gelu(h, approximate)

        w2 = w2_ref[...]
        if use_bf16:
            h = h.astype(jnp.bfloat16)
            w2 = w2.astype(jnp.bfloat16)
        else:
            h = h.astype(w2.dtype)
        acc_ref[...] += jnp.dot(h, w2, preferred_element_type=jnp.float32)

        @pl.when(k == pl.num_programs(1) - 1)
        def _finish():
            if acc_in_out:
                o_ref[...] += b2_ref[...].astype(o_ref.dtype)
            else:
                o_ref[...] = (acc_ref[...]
                              + b2_ref[...].astype(jnp.float32)).astype(o_ref.dtype)

    return kernel


def poswise_ffn(x, w1, b1, w2, b2, *, tm=None, tk=512,
                use_bf16_matmul=False, approximate_gelu=False):
    """x: (B, S, d_model). w1: (d_model, d_ff), w2: (d_ff, d_model)."""
    B, S, d_model = x.shape
    d_ff = w1.shape[1]
    T = B * S

    # ---- per-chip VMEM budget (headroom below physical capacity) ----------
    try:
        info = pltpu.get_tpu_info()
        vmem_cap = int(getattr(info, "vmem_capacity_bytes", 64 * 2**20))
    except Exception:
        vmem_cap = 64 * 2**20          # conservative (v7x-sized) fallback
    vmem_budget = int(vmem_cap * 25 // 32)   # ~78%: ~50 MiB v7x, ~100 MiB v5e/v6e

    # ---- lane-dense padding targets (tuned for d_model >= 128) ------------
    d_pad = _round_up(d_model, 128)
    f_pad = _round_up(d_ff, 128)

    x_isz = jnp.dtype(x.dtype).itemsize
    w_isz = jnp.dtype(w1.dtype).itemsize
    b_isz = jnp.dtype(b1.dtype).itemsize

    # ---- token tile: large, but always >= 2 tiles so v7x's 2 TCs get work -
    if tm is None:
        tm = 512 if vmem_budget >= 96 * 2**20 else 256
    t8 = _round_up(T, 8)
    tm = max(8, min(_round_up(tm, 8), t8))
    if t8 // tm < 2 and t8 >= 16:
        tm = max(8, _round_up(_cdiv(t8, 2), 8))
    T_pad = _round_up(t8, tm)
    n_tok_tiles = T_pad // tm

    # ---- resident-weights decision -----------------------------------------
    weight_bytes = 2 * d_pad * f_pad * w_isz + (f_pad + d_pad) * b_isz
    resident_need = (2 * weight_bytes                      # (possibly) double-buffered
                     + 2 * tm * d_pad * x_isz              # x tile
                     + 2 * tm * d_pad * x_isz              # out tile
                     + tm * f_pad * 4                      # fp32 hidden intermediate
                     + tm * d_pad * 4)                     # fp32 working set
    use_resident = resident_need <= vmem_budget

    if not use_resident:
        # k-tiled fallback: pick tk dividing f_pad, shrink tm until it fits.
        tk = min(tk, f_pad)
        if f_pad % tk != 0:
            tk = math.gcd(tk, f_pad)

        def ktiled_need(tm_):
            return (2 * tm_ * d_pad * x_isz                # x tile
                    + 2 * (d_pad * tk + tk * d_pad) * w_isz  # W1/W2 slices
                    + 2 * (tk + d_pad) * b_isz
                    + 2 * tm_ * d_pad * x_isz              # out tile
                    + tm_ * d_pad * 4                      # fp32 acc
                    + tm_ * tk * 4)                        # fp32 hidden slice

        while ktiled_need(tm) > vmem_budget and tm > 8:
            tm = max(8, _round_up(tm // 2, 8))
        T_pad = _round_up(t8, tm)
        n_tok_tiles = T_pad // tm

    # ---- pad only when necessary (aligned shapes pay nothing) -------------
    # TODO(synk): in a real model, pad/cache the weights once at init time
    # instead of per forward call.
    x2 = x.reshape(T, d_model)
    if T_pad != T or d_pad != d_model:
        x2 = jnp.pad(x2, ((0, T_pad - T), (0, d_pad - d_model)))
    w_aligned = (d_pad == d_model) and (f_pad == d_ff)
    w1p = w1 if w_aligned else jnp.pad(w1, ((0, d_pad - d_model), (0, f_pad - d_ff)))
    w2p = w2 if w_aligned else jnp.pad(w2, ((0, f_pad - d_ff), (0, d_pad - d_model)))
    b1p = (b1 if f_pad == d_ff else jnp.pad(b1, (0, f_pad - d_ff))).reshape(1, f_pad)
    b2p = (b2 if d_pad == d_model else jnp.pad(b2, (0, d_pad - d_model))).reshape(1, d_pad)

    # ---- cost estimate (actual traffic, per-array itemsizes) --------------
    weight_reads = 1 if use_resident else n_tok_tiles
    cost = pl.CostEstimate(
        flops=4 * T_pad * d_pad * f_pad,
        transcendentals=T_pad * f_pad,
        bytes_accessed=int(
            x2.size * jnp.dtype(x2.dtype).itemsize
            + T_pad * d_pad * x_isz
            + weight_reads * (w1p.size * jnp.dtype(w1p.dtype).itemsize
                              + w2p.size * jnp.dtype(w2p.dtype).itemsize
                              + b1p.size * jnp.dtype(b1p.dtype).itemsize
                              + b2p.size * jnp.dtype(b2p.dtype).itemsize)),
    )

    out_shape = jax.ShapeDtypeStruct((T_pad, d_pad), x.dtype)

    if use_resident:
        kernel = _make_resident_kernel(use_bf16_matmul, approximate_gelu)
        out2 = pl.pallas_call(
            kernel,
            out_shape=out_shape,
            grid_spec=pltpu.PrefetchScalarGridSpec(
                num_scalar_prefetch=0,
                grid=(n_tok_tiles,),
                in_specs=[
                    pl.BlockSpec((tm, d_pad), lambda i: (i, 0)),      # x tile
                    pl.BlockSpec((d_pad, f_pad), lambda i: (0, 0)),   # W1 (resident)
                    pl.BlockSpec((1, f_pad), lambda i: (0, 0)),       # b1 (resident)
                    pl.BlockSpec((f_pad, d_pad), lambda i: (0, 0)),   # W2 (resident)
                    pl.BlockSpec((1, d_pad), lambda i: (0, 0)),       # b2 (resident)
                ],
                out_specs=pl.BlockSpec((tm, d_pad), lambda i: (i, 0)),
            ),
            compiler_params=pltpu.CompilerParams(
                dimension_semantics=("parallel",),
                vmem_limit_bytes=vmem_budget,
            ),
            cost_estimate=cost,
        )(x2, w1p, b1p, w2p, b2p)
    else:
        acc_in_out = jnp.dtype(x.dtype) == jnp.dtype(jnp.float32)
        kernel = _make_ktiled_kernel(acc_in_out, use_bf16_matmul, approximate_gelu)
        scratch = [] if acc_in_out else [pltpu.VMEM((tm, d_pad), jnp.float32)]
        out2 = pl.pallas_call(
            kernel,
            out_shape=out_shape,
            grid_spec=pltpu.PrefetchScalarGridSpec(
                num_scalar_prefetch=0,
                grid=(n_tok_tiles, f_pad // tk),
                in_specs=[
                    pl.BlockSpec((tm, d_pad), lambda i, k: (i, 0)),   # x tile
                    pl.BlockSpec((d_pad, tk), lambda i, k: (0, k)),   # W1 k-slice
                    pl.BlockSpec((1, tk), lambda i, k: (0, k)),       # b1 k-slice
                    pl.BlockSpec((tk, d_pad), lambda i, k: (k, 0)),   # W2 k-slice
                    pl.BlockSpec((1, d_pad), lambda i, k: (0, 0)),    # b2
                ],
                out_specs=pl.BlockSpec((tm, d_pad), lambda i, k: (i, 0)),
                scratch_shapes=scratch,
            ),
            compiler_params=pltpu.CompilerParams(
                dimension_semantics=("parallel", "arbitrary"),
                vmem_limit_bytes=vmem_budget,
            ),
            cost_estimate=cost,
        )(x2, w1p, b1p, w2p, b2p)

    out = out2
    if T_pad != T or d_pad != d_model:
        out = out[:T, :d_model]
    return out.reshape(B, S, d_model)


def _reference(x, w1, b1, w2, b2):
    h = jnp.einsum("bsd,df->bsf", x, w1) + b1
    h = 0.5 * h * (1.0 + lax.erf(h / jnp.sqrt(2.0)))
    return jnp.einsum("bsf,fd->bsd", h, w2) + b2


if __name__ == "__main__":
    # Small shapes: batch=2, seq=8, d_model=32 -> d_ff=128
    B, S, d_model = 2, 8, 32
    d_ff = 4 * d_model

    key = jax.random.PRNGKey(0)
    kx, k1, k2, k3, k4 = jax.random.split(key, 5)

    x = jax.random.normal(kx, (B, S, d_model), dtype=jnp.float32)

    # Deterministic parameter init (uniform, like nn.Linear's default range)
    lim1 = 1.0 / math.sqrt(d_model)
    lim2 = 1.0 / math.sqrt(d_ff)
    w1 = jax.random.uniform(k1, (d_model, d_ff), jnp.float32, -lim1, lim1)
    b1 = jax.random.uniform(k2, (d_ff,), jnp.float32, -lim1, lim1)
    w2 = jax.random.uniform(k3, (d_ff, d_model), jnp.float32, -lim2, lim2)
    b2 = jax.random.uniform(k4, (d_model,), jnp.float32, -lim2, lim2)

    out = poswise_ffn(x, w1, b1, w2, b2)
    out = jax.block_until_ready(out)

    ref = _reference(x, w1, b1, w2, b2)
    assert out.shape == (B, S, d_model)
    assert jnp.allclose(out, ref, atol=1e-5, rtol=1e-5), "mismatch vs reference"

    print("KERNEL_OK")
</pallas_src>

<mosaic_0001>
module attributes {stable_mosaic.version = 11 : i64} {
  func.func @kernel(%arg0: i32, %arg1: memref<8x128xf32, #tpu.memory_space<vmem>>, %arg2: memref<128x128xf32, #tpu.memory_space<vmem>>, %arg3: memref<1x128xf32, #tpu.memory_space<vmem>>, %arg4: memref<128x128xf32, #tpu.memory_space<vmem>>, %arg5: memref<1x128xf32, #tpu.memory_space<vmem>>, %arg6: memref<8x128xf32, #tpu.memory_space<vmem>>) attributes {dimension_semantics = [#tpu.dimension_semantics<parallel>], iteration_bounds = array<i64: 2>, scalar_prefetch = 0 : i64, scratch_operands = 0 : i64, tpu.core_type = #tpu.core_type<tc>, window_params = [{transform_indices = @transform_0, window_bounds = array<i64: 8, 128>}, {pipeline_mode = #tpu.pipeline_mode<synchronous>, transform_indices = @transform_1, window_bounds = array<i64: 128, 128>}, {pipeline_mode = #tpu.pipeline_mode<synchronous>, transform_indices = @transform_2, window_bounds = array<i64: 1, 128>}, {pipeline_mode = #tpu.pipeline_mode<synchronous>, transform_indices = @transform_3, window_bounds = array<i64: 128, 128>}, {pipeline_mode = #tpu.pipeline_mode<synchronous>, transform_indices = @transform_4, window_bounds = array<i64: 1, 128>}, {transform_indices = @transform_5, window_bounds = array<i64: 8, 128>}]} {
    %c0 = arith.constant 0 : index
    %c0_0 = arith.constant 0 : index
    %0 = vector.load %arg1[%c0, %c0_0] : memref<8x128xf32, #tpu.memory_space<vmem>>, vector<8x128xf32>
    %c0_1 = arith.constant 0 : index
    %c0_2 = arith.constant 0 : index
    %1 = vector.load %arg2[%c0_1, %c0_2] : memref<128x128xf32, #tpu.memory_space<vmem>>, vector<128x128xf32>
    %cst = arith.constant dense<0.000000e+00> : vector<8x128xf32>
    %2 = tpu.matmul %0, %1, %cst {dimension_numbers = #tpu.dot_dimension_numbers<[1], [0], [0], [1], [0, 0, 1, 1], [], []>} : vector<8x128xf32>, vector<128x128xf32>, vector<8x128xf32> -> vector<8x128xf32>
    %c0_3 = arith.constant 0 : index
    %c0_4 = arith.constant 0 : index
    %3 = vector.load %arg3[%c0_3, %c0_4] : memref<1x128xf32, #tpu.memory_space<vmem>>, vector<1x128xf32>
    %4 = vector.broadcast %3 : vector<1x128xf32> to vector<8x128xf32>
    %5 = arith.addf %2, %4 : vector<8x128xf32>
    %cst_5 = arith.constant 5.000000e-01 : f32
    %6 = vector.broadcast %cst_5 : f32 to vector<8x128xf32>
    %7 = arith.mulf %6, %5 : vector<8x128xf32>
    %cst_6 = arith.constant 0.707106769 : f32
    %8 = vector.broadcast %cst_6 : f32 to vector<8x128xf32>
    %9 = arith.mulf %5, %8 : vector<8x128xf32>
    %10 = math.erf %9 : vector<8x128xf32>
    %cst_7 = arith.constant 1.000000e+00 : f32
    %11 = vector.broadcast %cst_7 : f32 to vector<8x128xf32>
    %12 = arith.addf %11, %10 : vector<8x128xf32>
    %13 = arith.mulf %7, %12 : vector<8x128xf32>
    %c0_8 = arith.constant 0 : index
    %c0_9 = arith.constant 0 : index
    %14 = vector.load %arg4[%c0_8, %c0_9] : memref<128x128xf32, #tpu.memory_space<vmem>>, vector<128x128xf32>
    %cst_10 = arith.constant dense<0.000000e+00> : vector<8x128xf32>
    %15 = tpu.matmul %13, %14, %cst_10 {dimension_numbers = #tpu.dot_dimension_numbers<[1], [0], [0], [1], [0, 0, 1, 1], [], []>} : vector<8x128xf32>, vector<128x128xf32>, vector<8x128xf32> -> vector<8x128xf32>
    %c0_11 = arith.constant 0 : index
    %c0_12 = arith.constant 0 : index
    %16 = vector.load %arg5[%c0_11, %c0_12] : memref<1x128xf32, #tpu.memory_space<vmem>>, vector<1x128xf32>
    %17 = vector.broadcast %16 : vector<1x128xf32> to vector<8x128xf32>
    %18 = arith.addf %15, %17 : vector<8x128xf32>
    %c0_13 = arith.constant 0 : index
    %c0_14 = arith.constant 0 : index
    %19 = vector.load %arg6[%c0_13, %c0_14] : memref<8x128xf32, #tpu.memory_space<vmem>>, vector<8x128xf32>
    tpu.vector_store %arg6[%c0_13, %c0_14], %18 {strides = array<i32>} : memref<8x128xf32, #tpu.memory_space<vmem>>, vector<8x128xf32>,
    return
  }
  func.func @transform_0(%arg0: i32) -> (i32, i32) {
    %c0_i32 = arith.constant 0 : i32
    %c0_i32_0 = arith.constant 0 : i32
    return %arg0, %c0_i32 : i32, i32
  }
  func.func @transform_1(%arg0: i32) -> (i32, i32) {
    %c0_i32 = arith.constant 0 : i32
    %c0_i32_0 = arith.constant 0 : i32
    %c0_i32_1 = arith.constant 0 : i32
    return %c0_i32, %c0_i32_0 : i32, i32
  }
  func.func @transform_2(%arg0: i32) -> (i32, i32) {
    %c0_i32 = arith.constant 0 : i32
    %c0_i32_0 = arith.constant 0 : i32
    %c0_i32_1 = arith.constant 0 : i32
    return %c0_i32, %c0_i32_0 : i32, i32
  }
  func.func @transform_3(%arg0: i32) -> (i32, i32) {
    %c0_i32 = arith.constant 0 : i32
    %c0_i32_0 = arith.constant 0 : i32
    %c0_i32_1 = arith.constant 0 : i32
    return %c0_i32, %c0_i32_0 : i32, i32
  }
  func.func @transform_4(%arg0: i32) -> (i32, i32) {
    %c0_i32 = arith.constant 0 : i32
    %c0_i32_0 = arith.constant 0 : i32
    %c0_i32_1 = arith.constant 0 : i32
    return %c0_i32, %c0_i32_0 : i32, i32
  }
  func.func @transform_5(%arg0: i32) -> (i32, i32) {
    %c0_i32 = arith.constant 0 : i32
    %c0_i32_0 = arith.constant 0 : i32
    return %arg0, %c0_i32 : i32, i32
  }
}

</mosaic_0001>

<bundles_post_ra>
// kernel: tpu_custom_call.1
= control target key start
LH: loop header
LB: loop body
LE: loop exit
PB: predicated region body
PF: predicated region fallthrough
CT: control target
= control target key end

     0   :  { %10 = vsyncpa [#allocation3], 0  ;;  %s1264_s0 = inlined_call_operand.hbm [shape: f32[16,128], index: 0, kind: input, shape index: {}]   ;;  %s1265_s1 = inlined_call_operand.hbm [shape: f32[128,128], index: 1, kind: input, shape index: {}]   ;;  %s1266_s2 = inlined_call_operand.vmem [shape: f32[1,128], index: 2, kind: input, shape index: {}]   ;;  %s1267_s3 = inlined_call_operand.hbm [shape: f32[128,128], index: 3, kind: input, shape index: {}]   ;;  %s1268_s4 = inlined_call_operand.vmem [shape: f32[1,128], index: 4, kind: input, shape index: {}]   ;;  %s1269_s5 = inlined_call_operand.hbm [shape: f32[16,128], index: 5, kind: output, shape index: {}]  }
   0x1   :  { %12 = vsyncpa [#allocation3 + $0x1], 0 }
   0x2   :  { %13 = vsyncpa [#allocation6], 0 }
   0x3   :  { %14 = vsyncpa [#allocation4], 0 }
   0x4   :  { %16 = vsyncpa [#allocation4 + $0x1], 0  ;;  %s1006_s18 = smov 0   ;;  %s1008_s19 = smov 0  }
   0x5   :  { %s1010_s20 = smov 0   ;;  %s1012_s21 = smov 0  }
   0x6 LB: > { %s1027_s22 = sadd.s32 4294967295, %s965_s21   ;;  %s565_s23 = sadd.s32 4294967294, %s965_s21   ;;  %s965_s21 = sphi %s1012_s21, %s1289_s21   ;;  %s961_s20 = sphi %s1010_s20, %s1288_s20   ;;  %s957_s19 = sphi %s1008_s19, %s1287_s19   ;;  %s953_s18 = sphi %s1006_s18, %s1286_s18  }
   0x7   : > { %p42_p0 = scmp.ne.s32.totalorder %s957_s19, %s953_s18  ;;  %p1270_p1 = scmp.eq.s32.totalorder %s1027_s22, 0 }
   0x8   : > { %p156_p3 = scmp.eq.s32.totalorder %s565_s23, 1  ;;  %p566_p5 = scmp.ge.s32.totalorder %s965_s21, 1 }
   0x9   : > { %p1036_p4 = por %p1270_p1, %p42_p0  ;;  %p163_p7 = scmp.lt.s32.totalorder %s965_s21, 3 }
   0xa   : > { %p1041_p6 = por %p156_p3, %p42_p0  ;;  %s967_s27 = smov [#allocation5]  }
   0xb   : > { %s1273_s24 = scalar_select %p1036_p4, 1, 0 }
   0xc   : > { %s1274_s25 = scalar_select %p1041_p6, 1, 0 }
   0xd   : > { %p1046_p8 = pnand %p566_p5, %p163_p7  ;;  %s175_s28 = sshll.u32 %s967_s27, 4  ;;  %s1050_s28 = int_to_ptr.vmem [resolvable:$true] %s175_s28 }
   0xe   : > { %s968_s30 = smov [#allocation7]   ;;  %s809_s9 = scalar_lea.hbm %s1265_s1, 2048 }
   0xf   : > { %p747_p9 = pneg %p1046_p8  ;;  %s191_s6 = sshll.u32 %s968_s30, 4  ;;  %s1061_s6 = int_to_ptr.vmem [resolvable:$true] %s191_s6 }
  0x10   : > { %p810_p12 = scmp.ne.s32.totalorder %s1265_s1, %s809_s9  ;;  %p816_p5 = scmp.lt.u32.totalorder %s809_s9, %s1265_s1 }
  0x11   : > { %p1057_p11 = pnand %p747_p9, %p1270_p1 }
  0x13   : > { %p811_p13 = pneg %p1057_p11 }
  0x15   : > { %p812_p0 = pnand %p811_p13, %p810_p12 }
  0x17   : > { %p813_p3 = pneg %p812_p0 }
  0x19   : > { %p818_p7 = pnand %p816_p5, %p813_p3 }
  0x1b   : > { %821 = shalt.err (!%p818_p7)
}
  0x1c   : > { %s822_s14 = scalar_lea.vmem %s1050_s28, 2048  ;;  %p830_p2 = scmp.lt.s32.totalorder %s1050_s28, %s1050_s28 }
  0x1d   : > { %p823_p9 = scmp.ne.s32.totalorder %s1050_s28, %s822_s14  ;;  %p831_p12 = scmp.lt.s32.totalorder %s822_s14, %s822_s14 }
  0x1f   : > { %p825_p10 = pnand %p823_p9, %p811_p13  ;;  %p832_p0 = por %p831_p12, %p830_p2 }
  0x21   : > { %p826_p1 = pneg %p825_p10 }
  0x23   : > { %p833_p6 = pnand %p832_p0, %p826_p1 }
  0x25   : > { %836 = shalt.err (!%p833_p6)
}
  0x26   : > { %s969_s15 = smov 128   ;;  %s970_s16 = smov 8  }
  0x27   : > { %750 = dma.hbm_to_vmem [thread:$0]  (!%p1057_p11), %s1265_s1, 2048, %s1050_s28, [#allocation6], %s969_s15, %s969_s15, %s970_s16  }
  0x28   : > { %s837_s7 = scalar_lea.hbm %s1267_s3, 2048 }
  0x29   : > { %p838_p2 = scmp.ne.s32.totalorder %s1267_s3, %s837_s7  ;;  %p844_p10 = scmp.lt.u32.totalorder %s837_s7, %s1267_s3 }
  0x2b   : > { %p840_p1 = pnand %p838_p2, %p811_p13 }
  0x2d   : > { %p841_p6 = pneg %p840_p1 }
  0x2f   : > { %p846_p3 = pnand %p844_p10, %p841_p6 }
  0x31   : > { %849 = shalt.err (!%p846_p3)
}
  0x32   : > { %s850_s28 = scalar_lea.vmem %s1061_s6, 2048  ;;  %p858_p12 = scmp.lt.s32.totalorder %s1061_s6, %s1061_s6 }
  0x33   : > { %p851_p5 = scmp.ne.s32.totalorder %s1061_s6, %s850_s28  ;;  %p859_p0 = scmp.lt.s32.totalorder %s850_s28, %s850_s28 }
  0x35   : > { %p853_p7 = pnand %p851_p5, %p811_p13  ;;  %p860_p2 = por %p859_p0, %p858_p12 }
  0x37   : > { %p854_p9 = pneg %p853_p7 }
  0x39   : > { %p861_p1 = pnand %p860_p2, %p854_p9 }
  0x3b   : > { %864 = shalt.err (!%p861_p1)
}
  0x3c   : > { %753 = dma.hbm_to_vmem [thread:$0]  (!%p1057_p11), %s1267_s3, 2048, %s1061_s6, [#allocation6], %s969_s15, %s969_s15, %s970_s16  }
  0x3d   : > { %s1116_s14 = sadd.s32 1, %s965_s21   ;;  %s29_s29 = sadd.s32 1, %s961_s20 }
  0x3e   : > { %s26_s17 = ssub.s32 %s965_s21, %s1116_s14  ;;  %p36_p13 = scmp.ne.s32.totalorder %s961_s20, %s957_s19 }
  0x3f   : > { %p27_p6 = scmp.eq.s32.totalorder %s26_s17, 0  ;;  %p37_p10 = scmp.eq.s32.totalorder %s965_s21, 0 }
  0x40   : > { %p1277_p3 = scmp.eq.s32.totalorder %s1027_s22, 1  ;;  %p764_p7 = scmp.lt.s32.totalorder %s965_s21, 2 }
  0x41   : > { %s1132_s27 = scalar_select %p27_p6, %s961_s20, %s29_s29  }
  0x42   : > { %p1126_p5 = por %p1277_p3, %p36_p13  ;;  %p38_p9 = por %p37_p10, %p36_p13 }
  0x43   : > { %s208_s30 = sand.u32 1, %s961_s20   ;;  %s571_s6 = sshll.u32 %s965_s21, 7 }
  0x44   : > { %s1278_s23 = scalar_select %p1126_p5, 1, 0 }
  0x45   : > { %s570_s7 = sshll.u32 %s208_s30, 3  ;;  %s1139_s8 = scalar_lea.hbm %s1264_s0, %s571_s6 }
  0x46   : > { %s212_s9 = scalar_lea.vmem [#allocation2], %s570_s7  ;;  %p1143_p11 = pnand %p764_p7, %p38_p9 }
  0x47   : > { %s219_s10 = sshll.u32 %s212_s9, 4  ;;  %s209_s28 = scalar_lea.sflag [#allocation3], %s208_s30  ;;  %s1141_s10 = int_to_ptr.vmem [resolvable:$true] %s219_s10 }
  0x48   : > { %s865_s12 = scalar_lea.hbm %s1139_s8, 128  ;;  %p867_p0 = pneg %p1143_p11 }
  0x49   : > { %p866_p12 = scmp.ne.s32.totalorder %s1139_s8, %s865_s12  ;;  %s870_s17 = scalar_lea.hbm %s1264_s0, 256 }
  0x4a   : > { %p871_p13 = scmp.lt.u32.totalorder %s1139_s8, %s1264_s0  ;;  %p872_p6 = scmp.lt.u32.totalorder %s870_s17, %s865_s12 }
  0x4b   : > { %p868_p2 = pnand %p867_p0, %p866_p12  ;;  %p874_p3 = scmp.lt.u32.totalorder %s865_s12, %s1139_s8 }
  0x4c   : > { %p873_p10 = por %p872_p6, %p871_p13 }
  0x4d   : > { %p869_p1 = pneg %p868_p2 }
  0x4e   : > { %p875_p7 = por %p874_p3, %p873_p10 }
  0x50   : > { %p876_p9 = pnand %p875_p7, %p869_p1 }
  0x52   : > { %879 = shalt.err (!%p876_p9)
}
  0x53   : > { %s880_s30 = scalar_lea.vmem %s1141_s10, 128  ;;  %s971_s15 = smov [#allocation2]  }
  0x54   : > { %p881_p12 = scmp.ne.s32.totalorder %s1141_s10, %s880_s30  ;;  %s885_s16 = sshll.u32 %s971_s15, 4  ;;  %s886_s16 = int_to_ptr.vmem [resolvable:$false] %s885_s16 }
  0x55   : > { %s887_s9 = scalar_lea.vmem %s886_s16, 256  ;;  %p888_p4 = scmp.lt.s32.totalorder %s1141_s10, %s886_s16 }
  0x56   : > { %p883_p2 = pnand %p881_p12, %p867_p0  ;;  %p889_p13 = scmp.lt.s32.totalorder %s887_s9, %s880_s30 }
  0x58   : > { %p884_p5 = pneg %p883_p2  ;;  %p890_p6 = por %p889_p13, %p888_p4 }
  0x5a   : > { %p891_p10 = pnand %p890_p6, %p884_p5 }
  0x5c   : > { %894 = shalt.err (!%p891_p10)
}
  0x5d   : > { %757 = dma.hbm_to_vmem [thread:$0]  (!%p1143_p11), %s1139_s8, 128, %s1141_s10, %s209_s28  }
  0x5e   : > { %228 = sbr.rel (%p1046_p8) target bundleno = 598 (0x256), region = 40  ;;  %s1175_s12 = sand.u32 (!%p1046_p8), 1, %s957_s19  }
  0x5f   : > { %s573_s13 = sshll.u32 (!%p1046_p8), %s1175_s12, 3  ;;  %s231_s29 = scalar_lea.sflag (!%p1046_p8), [#allocation3], %s1175_s12 }
  0x60   : > { %s1181_s17 = scalar_lea.vmem (!%p1046_p8), [#allocation2], %s573_s13  ;;  %p1280_p4 = scmp.ne.s32.totalorder (!%p1046_p8), %s1273_s24, 0 }
  0x65   : > { %940 = dma.done.wait (%p1280_p4), %s231_s29, 128  }
  0x66   : > { %942 = vsyncadd (%p1280_p4), %s231_s29, 4294967168  ;;  %p1281_p5 = scmp.eq.s32.totalorder %s1027_s22, 0 }
  0x68   : > { %944 = dma.done.wait (%p1281_p5), [#allocation6], 4096   ;;  %p1282_p8 = pmov %p1281_p5 }
  0x69   : > { %v972_v0 = vmov 0.0|0.0   ;;  %vm973_vm0 = vmmov 0   ;;  %v974_v1 = vmov 0.0   ;;  %v270_v2 = vld [vmem:[#allocation5] sm:$0xff]  ;;  %v271_v3 = vld [vmem:[#allocation5 + $0x8] sm:$0xff]  ;;  %v272_v4 = vld [vmem:[#allocation5 + $0x10] sm:$0xff] }
  0x6a   : > { %946 = vsyncadd (%p1282_p8), [#allocation6], 4294963200  ;;  %687 = vmatprep.subr.bf16.mxu0 %v972_v0  ;;  %649 = vmatprep.mubr.msk.f32.mxu0 %vm973_vm0, %v974_v1  ;;  %v688_v5 = vpack.c.bf16 %v271_v3, %v270_v2  ;;  %v273_v6 = vld [vmem:[#allocation5 + $0x18] sm:$0xff]  ;;  %v274_v8 = vld [vmem:[#allocation5 + $0x20] sm:$0xff]  ;;  %s580_s11 = sshll.u32 %s1027_s22, 7  ;;  %s268_s28 = scalar_lea.vmem [#allocation8], %s573_s13 }
  0x6b   : > { %711 = vmatprep.subr.bf16.mxu1 %v972_v0  ;;  %684 = vmatprep.mubr.msk.f32.mxu1 %vm973_vm0, %v974_v1  ;;  %v691_v7 = vpack.c.bf16 %v273_v6, %v272_v4  ;;  %v275_v9 = vld [vmem:[#allocation5 + $0x28] sm:$0xff]  ;;  %v368_v10 = vld [vmem:[#allocation7] sm:$0xff]  ;;  %v370_v12 = vld [vmem:[#allocation7 + $0x10] sm:$0xff]  ;;  %s476_s7 = sshll.u32 %s268_s28, 4  ;;  %s1220_s15 = scalar_lea.hbm %s1269_s5, %s580_s11  ;;  %s1222_s7 = int_to_ptr.vmem [resolvable:$true] %s476_s7 }
  0x6c   : > { %689 = vmatpush3.bf16.msra.mxu0 %v688_v5  ;;  %v369_v11 = vld [vmem:[#allocation7 + $0x8] sm:$0xff]  ;;  %v371_v13 = vld [vmem:[#allocation7 + $0x18] sm:$0xff]  ;;  %v694_v14 = vpack.c.bf16 %v275_v9, %v274_v8  ;;  %v276_v16 = vld [vmem:[#allocation5 + $0x30] sm:$0xff]  ;;  %s463_s16 = scalar_lea.sflag [#allocation4], %s1175_s12  ;;  %s895_s9 = scalar_lea.vmem %s1222_s7, 128 }
  0x6d   : > { %690 = vmatprep.subr.bf16.mxu0 %v972_v0  ;;  %v712_v15 = vpack.c.bf16 %v369_v11, %v368_v10  ;;  %v277_v17 = vld [vmem:[#allocation5 + $0x38] sm:$0xff]  ;;  %v715_v18 = vpack.c.bf16 %v371_v13, %v370_v12  ;;  %v372_v19 = vld [vmem:[#allocation7 + $0x20] sm:$0xff]  ;;  %v373_v20 = vld [vmem:[#allocation7 + $0x28] sm:$0xff]  ;;  %p896_p11 = scmp.ne.s32.totalorder %s1222_s7, %s895_s9  ;;  %p1283_p0 = scmp.ne.s32.totalorder %s1278_s23, 0 }
  0x6e   : > { %v697_v21 = vpack.c.bf16 %v277_v17, %v276_v16  ;;  %v278_v22 = vld [vmem:[#allocation5 + $0x40] sm:$0xff]  ;;  %v279_v23 = vld [vmem:[#allocation5 + $0x48] sm:$0xff]  ;;  %v718_v24 = vpack.c.bf16 %v373_v20, %v372_v19  ;;  %v280_v26 = vld [vmem:[#allocation5 + $0x50] sm:$0xff]  ;;  %s975_s22 = smov [#allocation8]  }
  0x6f   : > { %713 = vmatpush3.bf16.msra.mxu1 %v712_v15  ;;  %v700_v25 = vpack.c.bf16 %v279_v23, %v278_v22  ;;  %v281_v27 = vld [vmem:[#allocation5 + $0x58] sm:$0xff]  ;;  %v282_v29 = vld [vmem:[#allocation5 + $0x60] sm:$0xff]  ;;  %v283_v30 = vld [vmem:[#allocation5 + $0x68] sm:$0xff]  ;;  %p897_p1 = pnand %p896_p11, %p1283_p0  ;;  %s899_s13 = sshll.u32 %s975_s22, 4  ;;  %s900_s13 = int_to_ptr.vmem [resolvable:$false] %s899_s13 }
  0x70   : > { %692 = vmatpush3.bf16.msra.mxu0 %v691_v7  ;;  %714 = vmatprep.subr.bf16.mxu1 %v972_v0  ;;  %v703_v28 = vpack.c.bf16 %v281_v27, %v280_v26  ;;  %v706_v31 = vpack.c.bf16 %v283_v30, %v282_v29  ;;  %v284_v32 = vld [vmem:[#allocation5 + $0x70] sm:$0xff]  ;;  %v285_v33 = vld [vmem:[#allocation5 + $0x78] sm:$0xff]  ;;  %v376_v39 = vld [vmem:[#allocation7 + $0x40] sm:$0xff]  ;;  %s901_s29 = scalar_lea.vmem %s900_s13, 256  ;;  %p902_p7 = scmp.lt.s32.totalorder %s1222_s7, %s900_s13 }
  0x71   : > { %693 = vmatprep.subr.bf16.mxu0 %v972_v0  ;;  %v709_v34 = vpack.c.bf16 %v285_v33, %v284_v32  ;;  %v269_v35 = vld [vmem:[%s1181_s17] sm:$0xff]  ;;  %v377_v40 = vld [vmem:[#allocation7 + $0x48] sm:$0xff]  ;;  %v380_v45 = vld [vmem:[#allocation7 + $0x60] sm:$0xff]  ;;  %p898_p3 = pneg %p897_p1  ;;  %p903_p9 = scmp.lt.s32.totalorder %s901_s29, %s895_s9 }
  0x72   : > { %v374_v36 = vld [vmem:[#allocation7 + $0x30] sm:$0xff]  ;;  %v375_v37 = vld [vmem:[#allocation7 + $0x38] sm:$0xff]  ;;  %v724_v41 = vpack.c.bf16 %v377_v40, %v376_v39  ;;  %v381_v46 = vld [vmem:[#allocation7 + $0x68] sm:$0xff] }
  0x73   : > { %716 = vmatpush3.bf16.msra.mxu1 %v715_v18  ;;  %v721_v38 = vpack.c.bf16 %v375_v37, %v374_v36  ;;  %v378_v42 = vld [vmem:[#allocation7 + $0x50] sm:$0xff]  ;;  %v379_v43 = vld [vmem:[#allocation7 + $0x58] sm:$0xff]  ;;  %v730_v47 = vpack.c.bf16 %v381_v46, %v380_v45  ;;  %p904_p12 = por %p903_p9, %p902_p7 }
  0x74   : > { %695 = vmatpush3.bf16.msra.mxu0 %v694_v14  ;;  %717 = vmatprep.subr.bf16.mxu1 %v972_v0  ;;  %v727_v44 = vpack.c.bf16 %v379_v43, %v378_v42  ;;  %v382_v48 = vld [vmem:[#allocation7 + $0x70] sm:$0xff]  ;;  %v383_v49 = vld [vmem:[#allocation7 + $0x78] sm:$0xff] }
  0x75   : > { %696 = vmatprep.subr.bf16.mxu0 %v972_v0  ;;  %v733_v50 = vpack.c.bf16 %v383_v49, %v382_v48  ;;  %v577_v51 = vld [vmem:[%s1266_s2] ss:$0 sm:$0xff]  ;;  %p905_p2 = pnand %p904_p12, %p898_p3 }
  0x76   : > { %v578_v60 = vld [vmem:[%s1268_s4] ss:$0 sm:$0xff] }
  0x77   : > { %719 = vmatpush3.bf16.msra.mxu1 %v718_v24 }
  0x78   : > { %698 = vmatpush3.bf16.msra.mxu0 %v697_v21  ;;  %720 = vmatprep.subr.bf16.mxu1 %v972_v0 }
  0x79   : > { %699 = vmatprep.subr.bf16.mxu0 %v972_v0 }
  0x7b   : > { %722 = vmatpush3.bf16.msra.mxu1 %v721_v38 }
  0x7c   : > { %701 = vmatpush3.bf16.msra.mxu0 %v700_v25  ;;  %723 = vmatprep.subr.bf16.mxu1 %v972_v0 }
  0x7d   : > { %702 = vmatprep.subr.bf16.mxu0 %v972_v0 }
  0x7f   : > { %725 = vmatpush3.bf16.msra.mxu1 %v724_v41 }
  0x80   : > { %704 = vmatpush3.bf16.msra.mxu0 %v703_v28  ;;  %726 = vmatprep.subr.bf16.mxu1 %v972_v0 }
  0x81   : > { %705 = vmatprep.subr.bf16.mxu0 %v972_v0 }
  0x83   : > { %728 = vmatpush3.bf16.msra.mxu1 %v727_v44 }
  0x84   : > { %707 = vmatpush3.bf16.msra.mxu0 %v706_v31  ;;  %729 = vmatprep.subr.bf16.mxu1 %v972_v0 }
  0x85   : > { %708 = vmatprep.subr.bf16.mxu0 %v972_v0 }
  0x87   : > { %731 = vmatpush3.bf16.msra.mxu1 %v730_v47 }
  0x88   : > { %710 = vmatpush3.bf16.msra.mxu0 %v709_v34  ;;  %732 = vmatprep.subr.bf16.mxu1 %v972_v0 }
  0x8b   : > { %650 = vmatmul.mubr.f32.vlgmr.msra.gmra.mrb[0].mxu0 %v269_v35  ;;  %734 = vmatpush3.bf16.msra.mxu1 %v733_v50 }
 0x15e   : > { %v359_v52 = vpop.f32.mrb[0].mxu0 }
 0x15f   : > { %v360_v53 = vadd.f32 %v577_v51, %v359_v52  ;;  %v651_v54 = vpop.f32.mrb[1].mxu0 }
 0x161   : > { %v364_v55 = vmul.f32 0.70710677, %v360_v53  ;;  %v363_v57 = vmul.f32 0.5, %v360_v53 }
 0x163   : > { %807 = verf.f32 %v364_v55 }
 0x16d   : > { %v808_v56 = vpop.eup %807 }
 0x16e   : > { %v366_v58 = vadd.f32 1.0, %v808_v56 }
 0x170   : > { %v367_v59 = vmul.f32 %v366_v58, %v363_v57 }
 0x172   : > { %685 = vmatmul.mubr.f32.vlgmr.msra.gmra.mrb[0].mxu1 %v367_v59 }
 0x245   : > { %v457_v61 = vpop.f32.mrb[0].mxu1 }
 0x246   : > { %v458_v62 = vadd.f32 %v578_v60, %v457_v61  ;;  %v686_v63 = vpop.f32.mrb[1].mxu1 }
 0x248   : > { %461 = vst [vmem:[%s268_s28] sm:$0xff] %v458_v62 }
 0x249   : > { %908 = shalt.err (!%p905_p2)
}
 0x24a   : > { %s909_s12 = scalar_lea.hbm %s1220_s15, 128  ;;  %s913_s26 = scalar_lea.hbm %s1269_s5, 256 }
 0x24b   : > { %p910_p13 = scmp.ne.s32.totalorder %s1220_s15, %s909_s12  ;;  %p914_p4 = scmp.lt.u32.totalorder %s1220_s15, %s1269_s5 }
 0x24c   : > { %p915_p5 = scmp.lt.u32.totalorder %s913_s26, %s909_s12  ;;  %p917_p11 = scmp.lt.u32.totalorder %s909_s12, %s1220_s15 }
 0x24d   : > { %p911_p6 = pnand %p910_p13, %p1283_p0 }
 0x24e   : > { %p916_p8 = por %p915_p5, %p914_p4 }
 0x24f   : > { %p912_p10 = pneg %p911_p6 }
 0x250   : > { %p918_p1 = por %p917_p11, %p916_p8 }
 0x252   : > { %p919_p3 = pnand %p918_p1, %p912_p10 }
 0x254   : > { %922 = shalt.err (!%p919_p3)
}
 0x255   : > { %745 = dma.vmem_to_hbm [thread:$0]  (%p1283_p0), %s1222_s7, 128, %s1220_s15, %s463_s16  }
 0x256 PF: > { %s488_s11 = sand.u32 1, %s953_s18   ;;  %p1284_p7 = scmp.ne.s32.totalorder %s1274_s25, 0 }
 0x257   : > { %p1285_p9 = scmp.ge.s32.totalorder %s965_s21, 2  ;;  %s489_s28 = scalar_lea.sflag [#allocation4], %s488_s11 }
 0x259   : > { %p759_p12 = pnand %p1285_p9, %p1284_p7 }
 0x25b   : > { %948 = dma.done.wait (!%p759_p12), %s489_s28, 128  }
 0x25c   : > { %950 = vsyncadd (!%p759_p12), %s489_s28, 4294967168  ;;  %p19_p2 = scmp.ge.s32.totalorder %s1116_s14, 4   ;;  %s1286_s18 = smov %s957_s19 }
 0x25d   : > { %s1287_s19 = smov %s961_s20  ;;  %s1288_s20 = smov %s1132_s27 }
 0x25e   : > { %s1289_s21 = smov %s1116_s14  ;;  %21 = sbr.rel (!%p19_p2) target bundleno = 6 (0x6), region = 93 }
 0x265   :  { %494 = vsyncpa [#allocation3], 1 }
 0x266   :  { %496 = vsyncpa [#allocation3 + $0x1], 1 }
 0x267   :  { %497 = vsyncpa [#allocation6], 1 }
 0x268   :  { %498 = vsyncpa [#allocation4], 1 }
 0x269   :  { %500 = vsyncpa [#allocation4 + $0x1], 1 }

</bundles_post_ra>
